<compile_context>
chip_gen: v6e
topology: v6e:2x2x1
jax: 0.10.0
libtpu: 0.0.40
codegen_flags: <defaults>
</compile_context>

<pallas_src>
import functools
import math

import numpy as np

import jax
import jax.numpy as jnp
from jax.experimental import pallas as pl
from jax.experimental.pallas import tpu as pltpu


def _make_selector(h, w, h_out, w_out, dtype):
    """One-hot (H*W, Ho*Wo) matrix selecting input (2i, 2j) for output (i, j)."""
    hw, hwo = h * w, h_out * w_out
    q = np.arange(hwo)
    src = 2 * (q // w_out) * w + 2 * (q % w_out)           # input flat index per output col
    sel = (np.arange(hw)[:, None] == src[None, :]).astype(np.float32)
    return jnp.asarray(sel, dtype=dtype)


def _pick_batch_tile(n, c, hw, itemsize):
    """Images per grid step.

    Big enough to amortize per-step overhead (~0.35 us), capped so the static
    per-image store unroll stays small; block sublane dim (b*c) must be a
    multiple of 8 unless b == n; prefer >= 2 grid steps (v7x has 2 TCs).
    """
    target_bytes = 512 * 1024
    img_bytes = max(1, c * hw * itemsize)
    b = max(1, min(n, 64, target_bytes // img_bytes))
    if b >= n and n > 1:
        b = -(-n // 2)                      # try for >= 2 grid steps
    granule = 8 // math.gcd(8, c)           # smallest b with (b * c) % 8 == 0
    b = max(granule, (b // granule) * granule)
    if b >= n:
        b = n                               # full-batch block (b*c == n*c is always legal)
    return b


def _subsample_pad_kernel(sel_ref, x_ref, o_ref, *, c, pad):
    # sel_ref: (H*W, Ho*Wo)    constant one-hot stride-2 spatial selector (resident)
    # x_ref:   (B*C, H*W)      batch-tile of the channel-flattened input
    # o_ref:   (B, C_out, Ho*Wo)
    b = o_ref.shape[0]

    x = x_ref[...]
    if x.dtype != sel_ref.dtype:
        x = x.astype(sel_ref.dtype)

    # Stride-2 spatial subsample as ONE one-hot matmul per grid step with the
    # batch folded into M (= B*C).  Exact since the selector entries are 0/1.
    sub = jnp.dot(x, sel_ref[...], preferred_element_type=jnp.float32)   # (B*C, HWo)
    sub = sub.astype(o_ref.dtype)

    # Channel zero-pad: zero the block once, then a static sublane-slice store
    # of each image's C real channels into [pad, pad+C) (no second matmul).
    o_ref[...] = jnp.zeros(o_ref.shape, o_ref.dtype)
    for i in range(b):                       # static unroll; b is capped in the wrapper
        o_ref[i, pad:pad + c, :] = sub[i * c:(i + 1) * c, :]


def lambda_layer(x_nchw, planes):
    """Pallas implementation of the option-'A' shortcut lambda (NCHW in/out)."""
    n, c, h, w = x_nchw.shape
    pad = planes // 4
    c_out = c + 2 * pad
    h_out = (h + 1) // 2          # matches PyTorch x[:, :, ::2, ::2] for odd dims too
    w_out = (w + 1) // 2
    hw, hwo = h * w, h_out * w_out

    # Exact in bf16 or f32 (selector is one-hot); keep bf16 inputs in bf16.
    if x_nchw.dtype in (jnp.bfloat16, jnp.float32):
        compute_dtype = x_nchw.dtype
    else:
        compute_dtype = jnp.float32

    sel = _make_selector(h, w, h_out, w_out, compute_dtype)
    b = _pick_batch_tile(n, c, hw, x_nchw.dtype.itemsize)

    # Free reshape (no transpose, no copy): fold channel into the row axis so the
    # kernel's matmul has M = B*C.
    x_flat = x_nchw.reshape(n * c, hw)

    out = pl.pallas_call(
        functools.partial(_subsample_pad_kernel, c=c, pad=pad),
        out_shape=jax.ShapeDtypeStruct((n, c_out, hwo), x_nchw.dtype),
        grid_spec=pltpu.PrefetchScalarGridSpec(
            num_scalar_prefetch=0,
            grid=(pl.cdiv(n, b),),
            in_specs=[
                pl.BlockSpec((hw, hwo), lambda i: (0, 0)),        # resident constant
                pl.BlockSpec((b * c, hw), lambda i: (i, 0)),      # batch tile (rows)
            ],
            out_specs=pl.BlockSpec((b, c_out, hwo), lambda i: (i, 0, 0)),
        ),
        compiler_params=pltpu.CompilerParams(
            dimension_semantics=("parallel",)),
    )(sel, x_flat)

    # Free reshape back to NCHW.
    return out.reshape(n, c_out, h_out, w_out)


if __name__ == "__main__":
    key = jax.random.PRNGKey(0)
    # small shapes consistent with the module's usage in the CIFAR-style ResNet:
    # batch=2, in_channels=4, spatial=16x16, planes = 2*in_channels = 8
    x = jax.random.normal(key, (2, 4, 16, 16), dtype=jnp.float32)
    planes = 8
    pad = planes // 4

    out = jax.block_until_ready(lambda_layer(x, planes))

    # pure-JAX reference for the same lambda
    ref = jnp.pad(x[:, :, ::2, ::2], ((0, 0), (pad, pad), (0, 0), (0, 0)))

    assert out.shape == ref.shape, (out.shape, ref.shape)
    assert out.dtype == ref.dtype, (out.dtype, ref.dtype)
    assert jnp.allclose(out, ref), "mismatch vs reference"

    print("KERNEL_OK")
</pallas_src>

<mosaic_0001>
module attributes {stable_mosaic.version = 11 : i64} {
  func.func @_subsample_pad_kernel(%arg0: i32, %arg1: memref<256x64xf32, #tpu.memory_space<vmem>>, %arg2: memref<8x256xf32, #tpu.memory_space<vmem>>, %arg3: memref<2x8x64xf32, #tpu.memory_space<vmem>>) attributes {dimension_semantics = [#tpu.dimension_semantics<parallel>], iteration_bounds = array<i64: 1>, scalar_prefetch = 0 : i64, scratch_operands = 0 : i64, tpu.core_type = #tpu.core_type<tc>, window_params = [{pipeline_mode = #tpu.pipeline_mode<synchronous>, transform_indices = @transform_0, window_bounds = array<i64: 256, 64>}, {transform_indices = @transform_1, window_bounds = array<i64: 8, 256>}, {transform_indices = @transform_2, window_bounds = array<i64: 2, 8, 64>}]} {
    %c0 = arith.constant 0 : index
    %c0_0 = arith.constant 0 : index
    %0 = vector.load %arg2[%c0, %c0_0] : memref<8x256xf32, #tpu.memory_space<vmem>>, vector<8x256xf32>
    %c0_1 = arith.constant 0 : index
    %c0_2 = arith.constant 0 : index
    %1 = vector.load %arg1[%c0_1, %c0_2] : memref<256x64xf32, #tpu.memory_space<vmem>>, vector<256x64xf32>
    %cst = arith.constant dense<0.000000e+00> : vector<8x64xf32>
    %2 = tpu.matmul %0, %1, %cst {dimension_numbers = #tpu.dot_dimension_numbers<[1], [0], [0], [1], [0, 0, 1, 1], [], []>} : vector<8x256xf32>, vector<256x64xf32>, vector<8x64xf32> -> vector<8x64xf32>
    %cst_3 = arith.constant 0.000000e+00 : f32
    %3 = vector.broadcast %cst_3 : f32 to vector<2x8x64xf32>
    %c0_4 = arith.constant 0 : index
    %c0_5 = arith.constant 0 : index
    %c0_6 = arith.constant 0 : index
    %4 = vector.load %arg3[%c0_4, %c0_5, %c0_6] : memref<2x8x64xf32, #tpu.memory_space<vmem>>, vector<2x8x64xf32>
    tpu.vector_store %arg3[%c0_4, %c0_5, %c0_6], %3 {strides = array<i32>} : memref<2x8x64xf32, #tpu.memory_space<vmem>>, vector<2x8x64xf32>,
    %5 = vector.extract_strided_slice %2 {offsets = [0, 0], sizes = [4, 64], strides = [1, 1]} : vector<8x64xf32> to vector<4x64xf32>
    %c0_7 = arith.constant 0 : index
    %c2 = arith.constant 2 : index
    %c0_8 = arith.constant 0 : index
    %6 = vector.load %arg3[%c0_7, %c2, %c0_8] : memref<2x8x64xf32, #tpu.memory_space<vmem>>, vector<1x4x64xf32>
    %7 = vector.shape_cast %6 : vector<1x4x64xf32> to vector<4x64xf32>
    %8 = vector.shape_cast %5 : vector<4x64xf32> to vector<1x4x64xf32>
    tpu.vector_store %arg3[%c0_7, %c2, %c0_8], %8 {strides = array<i32>} : memref<2x8x64xf32, #tpu.memory_space<vmem>>, vector<1x4x64xf32>,
    %9 = vector.extract_strided_slice %2 {offsets = [4, 0], sizes = [4, 64], strides = [1, 1]} : vector<8x64xf32> to vector<4x64xf32>
    %c1 = arith.constant 1 : index
    %c2_9 = arith.constant 2 : index
    %c0_10 = arith.constant 0 : index
    %10 = vector.load %arg3[%c1, %c2_9, %c0_10] : memref<2x8x64xf32, #tpu.memory_space<vmem>>, vector<1x4x64xf32>
    %11 = vector.shape_cast %10 : vector<1x4x64xf32> to vector<4x64xf32>
    %12 = vector.shape_cast %9 : vector<4x64xf32> to vector<1x4x64xf32>
    tpu.vector_store %arg3[%c1, %c2_9, %c0_10], %12 {strides = array<i32>} : memref<2x8x64xf32, #tpu.memory_space<vmem>>, vector<1x4x64xf32>,
    return
  }
  func.func @transform_0(%arg0: i32) -> (i32, i32) {
    %c0_i32 = arith.constant 0 : i32
    %c0_i32_0 = arith.constant 0 : i32
    %c0_i32_1 = arith.constant 0 : i32
    return %c0_i32, %c0_i32_0 : i32, i32
  }
  func.func @transform_1(%arg0: i32) -> (i32, i32) {
    %c0_i32 = arith.constant 0 : i32
    %c0_i32_0 = arith.constant 0 : i32
    return %arg0, %c0_i32 : i32, i32
  }
  func.func @transform_2(%arg0: i32) -> (i32, i32, i32) {
    %c0_i32 = arith.constant 0 : i32
    %c0_i32_0 = arith.constant 0 : i32
    %c0_i32_1 = arith.constant 0 : i32
    return %arg0, %c0_i32, %c0_i32_0 : i32, i32, i32
  }
}

</mosaic_0001>

<bundles_post_ra>
// kernel: tpu_custom_call.1
= control target key start
LH: loop header
LB: loop body
LE: loop exit
PB: predicated region body
PF: predicated region fallthrough
CT: control target
= control target key end

     0   :  { %s325_s0 = inlined_call_operand.vmem [shape: f32[256,64], index: 0, kind: input, shape index: {}]   ;;  %s326_s1 = inlined_call_operand.vmem [shape: f32[8,256], index: 1, kind: input, shape index: {}]   ;;  %s327_s2 = inlined_call_operand.hbm [shape: f32[2,8,64], index: 2, kind: output, shape index: {}]  }
   0x1   :  { %v45_v0 = vld [vmem:[%s325_s0 + $0xf8] sm:$0xff]  ;;  %v44_v2 = vld [vmem:[%s325_s0 + $0xf0] sm:$0xff]  ;;  %v43_v4 = vld [vmem:[%s325_s0 + $0xe8] sm:$0xff] }
   0x2   :  { %v29_v1 = vld [vmem:[%s325_s0 + $0x78] sm:$0xff]  ;;  %140 = vmatprep.subr.mxu0 %v45_v0  ;;  %v28_v3 = vld [vmem:[%s325_s0 + $0x70] sm:$0xff]  ;;  %v27_v5 = vld [vmem:[%s325_s0 + $0x68] sm:$0xff] }
   0x3   :  { %141 = vmatpush3.msra.mxu0 %v29_v1  ;;  %v42_v6 = vld [vmem:[%s325_s0 + $0xe0] sm:$0xff]  ;;  %v41_v8 = vld [vmem:[%s325_s0 + $0xd8] sm:$0xff]  ;;  %v40_v10 = vld [vmem:[%s325_s0 + $0xd0] sm:$0xff] }
   0x4   :  { %142 = vmatprep.subr.mxu0 %v44_v2  ;;  %v26_v7 = vld [vmem:[%s325_s0 + $0x60] sm:$0xff]  ;;  %v25_v9 = vld [vmem:[%s325_s0 + $0x58] sm:$0xff]  ;;  %v24_v11 = vld [vmem:[%s325_s0 + $0x50] sm:$0xff] }
   0x5   :  { %143 = vmatpush3.msra.mxu0 %v28_v3  ;;  %v39_v12 = vld [vmem:[%s325_s0 + $0xc8] sm:$0xff] }
   0x6   :  { %144 = vmatprep.subr.mxu0 %v43_v4  ;;  %v13_v13 = vld [vmem:[%s326_s1 + $0x8] sm:$0xff] }
   0x7   :  { %145 = vmatpush3.msra.mxu0 %v27_v5  ;;  %v23_v14 = vld [vmem:[%s325_s0 + $0x48] sm:$0xff]  ;;  %110 = vmatprep.mubr.f32.mxu0 %v13_v13 }
   0x8   :  { %146 = vmatprep.subr.mxu0 %v42_v6 }
   0x9   :  { %147 = vmatpush3.msra.mxu0 %v26_v7 }
   0xa   :  { %148 = vmatprep.subr.mxu0 %v41_v8 }
   0xb   :  { %149 = vmatpush3.msra.mxu0 %v25_v9 }
   0xc   :  { %150 = vmatprep.subr.mxu0 %v40_v10 }
   0xd   :  { %7 = vsyncpa [#allocation3], 0  ;;  %151 = vmatpush3.msra.mxu0 %v24_v11  ;;  %v38_v15 = vld [vmem:[%s325_s0 + $0xc0] sm:$0xff]  ;;  %v37_v17 = vld [vmem:[%s325_s0 + $0xb8] sm:$0xff]  ;;  %vm116_vm0 = vcmask 523264   ;;  %v201_v34 = vmov 0.0  }
   0xe   :  { %152 = vmatprep.subr.mxu0 %v39_v12  ;;  %v22_v16 = vld [vmem:[%s325_s0 + $0x40] sm:$0xff]  ;;  %v21_v18 = vld [vmem:[%s325_s0 + $0x38] sm:$0xff]  ;;  %v36_v19 = vld [vmem:[%s325_s0 + $0xb0] sm:$0xff]  ;;  %117 = vst.msk [vmem:[#allocation2] sm:$0xff] %vm116_vm0, %v201_v34  ;;  %s202_s21 = smov [#allocation2]   ;;  %vm119_vm1 = vcmask 519168  }
   0xf   :  { %153 = vmatpush3.msra.mxu0 %v23_v14  ;;  %v20_v20 = vld [vmem:[%s325_s0 + $0x30] sm:$0xff]  ;;  %v35_v21 = vld [vmem:[%s325_s0 + $0xa8] sm:$0xff]  ;;  %v34_v23 = vld [vmem:[%s325_s0 + $0xa0] sm:$0xff]  ;;  %118 = vst.msk [vmem:[#allocation2 + $0x8] sm:$0xff] %vm116_vm0, %v201_v34  ;;  %s129_s22 = sshll.u32 %s202_s21, 4  ;;  %vm122_vm2 = vcmask 523268   ;;  %s130_s22 = int_to_ptr.vmem [resolvable:$true] %s129_s22 }
  0x10   :  { %154 = vmatprep.subr.mxu0 %v38_v15  ;;  %v19_v22 = vld [vmem:[%s325_s0 + $0x28] sm:$0xff]  ;;  %v18_v24 = vld [vmem:[%s325_s0 + $0x20] sm:$0xff]  ;;  %v33_v25 = vld [vmem:[%s325_s0 + $0x98] sm:$0xff]  ;;  %p184_p1 = scmp.lt.s32.totalorder %s130_s22, %s130_s22 }
  0x11   :  { %155 = vmatpush3.msra.mxu0 %v22_v16  ;;  %v17_v26 = vld [vmem:[%s325_s0 + $0x18] sm:$0xff]  ;;  %v32_v27 = vld [vmem:[%s325_s0 + $0x90] sm:$0xff]  ;;  %v31_v29 = vld [vmem:[%s325_s0 + $0x88] sm:$0xff] }
  0x12   :  { %156 = vmatprep.subr.mxu0 %v37_v17  ;;  %v16_v28 = vld [vmem:[%s325_s0 + $0x10] sm:$0xff]  ;;  %v15_v30 = vld [vmem:[%s325_s0 + $0x8] sm:$0xff]  ;;  %v30_v31 = vld [vmem:[%s325_s0 + $0x80] sm:$0xff] }
  0x13   :  { %157 = vmatpush3.msra.mxu0 %v21_v18  ;;  %v14_v32 = vld [vmem:[%s325_s0] sm:$0xff]  ;;  %s179_s0 = scalar_lea.vmem %s130_s22, 256 }
  0x14   :  { %158 = vmatprep.subr.mxu0 %v36_v19  ;;  %v12_v33 = vld [vmem:[%s326_s1] sm:$0xff]  ;;  %p180_p0 = scmp.ne.s32.totalorder %s130_s22, %s179_s0  ;;  %p185_p2 = scmp.lt.s32.totalorder %s179_s0, %s179_s0 }
  0x15   :  { %159 = vmatpush3.msra.mxu0 %v20_v20 }
  0x16   :  { %160 = vmatprep.subr.mxu0 %v35_v21  ;;  %p186_p3 = por %p185_p2, %p184_p1 }
  0x17   :  { %161 = vmatpush3.msra.mxu0 %v19_v22 }
  0x18   :  { %162 = vmatprep.subr.mxu0 %v34_v23  ;;  %p187_p4 = pnand %p186_p3, %p180_p0 }
  0x19   :  { %163 = vmatpush3.msra.mxu0 %v18_v24 }
  0x1a   :  { %164 = vmatprep.subr.mxu0 %v33_v25 }
  0x1b   :  { %165 = vmatpush3.msra.mxu0 %v17_v26 }
  0x1c   :  { %166 = vmatprep.subr.mxu0 %v32_v27 }
  0x1d   :  { %167 = vmatpush3.msra.mxu0 %v16_v28 }
  0x1e   :  { %168 = vmatprep.subr.mxu0 %v31_v29 }
  0x1f   :  { %169 = vmatpush3.msra.mxu0 %v15_v30 }
  0x20   :  { %170 = vmatprep.subr.mxu0 %v30_v31 }
  0x21   :  { %171 = vmatpush3.msra.mxu0 %v14_v32 }
  0x22   :  { %111 = vmatmul.mubr.f32.vlgmr.msra.gmra.mxu0 %v12_v33 }
  0xe2   :  { %v172_v35 = vpop.f32.mrf.mxu0 }
  0xe4   :  { %v173_v36 = vpop.f32.mrf.mxu0 }
  0xe5   :  { %v174_v37 = vadd.f32 %v173_v36, %v172_v35 }
  0xe7   :  { %120 = vst.msk [vmem:[#allocation2 + $0x2] sm:$0xf] %vm119_vm1, %v174_v37 }
  0xe8   :  { %123 = vst.msk [vmem:[#allocation2 + $0x6] sm:$0xf0] %vm122_vm2, %v174_v37 }
  0xe9   :  { %190 = shalt.err (!%p187_p4)
}
  0xea   :  { %s203_s1 = smov 128   ;;  %s204_s23 = smov 8  }
  0xeb   :  { %135 = dma.vmem_to_hbm [thread:$0]  %s130_s22, 256, %s327_s2, [#allocation3], %s203_s1, %s203_s1, %s204_s23  }
  0xec   :  { %199 = dma.done.wait [#allocation3], 256  }
  0xed   :  { %200 = vsyncadd [#allocation3], 4294967040 }
  0xee   :  { %139 = vsyncpa [#allocation3], 1 }

</bundles_post_ra>
